<compile_context>
chip_gen: v5e
topology: v5e:2x2
jax: 0.10.0
libtpu: 0.0.40
codegen_flags: <defaults>
</compile_context>

<pallas_src>
import functools

import jax
import jax.numpy as jnp
from jax.experimental import pallas as pl
from jax.experimental.pallas import tpu as pltpu

ALPHA = 1.0
BETA = 1.0


def _round_up(v, m):
    return (v + m - 1) // m * m


def _cdiv(a, b):
    return (a + b - 1) // b


def _vmem_capacity_bytes():
    try:
        cap = getattr(pltpu.get_tpu_info(), "vmem_capacity_bytes", None)
        if cap:
            return int(cap)
    except Exception:
        pass
    return 64 * 2 ** 20  # conservative fallback (v7x per-TC VMEM)


# --------------------------------------------------------------------------- #
# Kernel
# --------------------------------------------------------------------------- #
def _kan_kernel(x_ref, coeff_ref, o_ref, jac_ref, *, degree, a, b,
                input_dim, pad_k):
    # x_ref:     (tb, I)     f32
    # coeff_ref: (Kpad, tn)  matmul dtype (bf16 default)
    # o_ref:     (tb, tn)    f32
    # jac_ref:   (tb, Kpad)  matmul-dtype VMEM scratch (Jacobi feature slab)
    dt = jac_ref.dtype
    x = jnp.tanh(x_ref[...])                                   # f32 VPU/EUP

    # Jacobi three-term recurrence, statically unrolled (degree is static).
    # Only 3 terms are live in vregs at any time; each degree is stored
    # straight into the VMEM slab at lane offset d*I (degree-major K layout).
    p_prev2 = jnp.ones_like(x)                                 # P_0
    jac_ref[:, 0:input_dim] = p_prev2.astype(dt)
    p_prev = p_prev2
    if degree > 0:
        p_prev = (a - b + (a + b + 2.0) * x) * 0.5             # P_1
        jac_ref[:, input_dim:2 * input_dim] = p_prev.astype(dt)
    for i in range(2, degree + 1):
        A = (2 * i + a + b - 1) * (2 * i + a + b) / (2 * i * (i + a + b))
        B = (2 * i + a + b - 1) * (a ** 2 - b ** 2) / (
            2 * i * (i + a + b) * (2 * i + a + b - 2))
        C = (-2 * (i + a - 1) * (i + b - 1) * (2 * i + a + b)
             / (2 * i * (i + a + b) * (2 * i + a + b - 2)))
        p_cur = (A * x + B) * p_prev + C * p_prev2
        jac_ref[:, i * input_dim:(i + 1) * input_dim] = p_cur.astype(dt)
        p_prev2, p_prev = p_prev, p_cur

    if pad_k:
        # Zero the K-pad columns: they face zero coeff rows, but the VMEM
        # scratch is uninitialized and NaN*0 would poison the accumulate.
        jac_ref[:, (degree + 1) * input_dim:] = jnp.zeros(
            (x.shape[0], pad_k), dt)

    # Single fused MXU matmul over K = (D+1)*I (padded), f32 accumulation.
    o_ref[...] = jnp.dot(
        jac_ref[...], coeff_ref[...], preferred_element_type=jnp.float32
    ).astype(o_ref.dtype)


# --------------------------------------------------------------------------- #
# Wrapper-side helpers
# --------------------------------------------------------------------------- #
def prepare_kan_coeffs(jacobi_coeffs, matmul_dtype=jnp.bfloat16):
    """(I, O, D+1) PyTorch layout -> (Kpad, Opad) fused-K coefficient matrix.

    Hoist this out of the hot forward path: call once per parameter update."""
    input_dim, output_dim, dp1 = jacobi_coeffs.shape
    K = dp1 * input_dim
    Kpad = _round_up(K, 128)
    Opad = _round_up(output_dim, 128)
    # (I, O, D+1) -> (D+1, I, O) -> (K, O): row block d holds coeffs[:, :, d].
    c = jnp.transpose(jacobi_coeffs, (2, 0, 1)).reshape(K, output_dim)
    c = jnp.pad(c, ((0, Kpad - K), (0, Opad - output_dim)))
    return c.astype(matmul_dtype)


def _choose_tiles(batch, input_dim, Kpad, output_dim, tb_req, mm_bytes,
                  vmem_budget):
    Opad = _round_up(output_dim, 128)
    m = Opad // 128
    # Largest-first 128-multiples <= 1024 that divide Opad (no over-padding).
    tn_cands = [128 * d for d in range(m, 0, -1)
                if m % d == 0 and 128 * d <= 1024]

    # Batch tile: multiple of 8, large enough to amortize per-step overhead,
    # but capped so the grid exposes >= 2 batch tiles (megacore on v7x).
    tb_cap = _round_up(_cdiv(batch, 2), 8) if batch >= 16 else _round_up(batch, 8)
    tb = max(8, min(_round_up(tb_req, 8), tb_cap))

    def working_set(tb_, tn_):
        return (2 * tb_ * input_dim * 4          # x tile, double-buffered
                + 2 * Kpad * tn_ * mm_bytes      # coeff tile, double-buffered
                + 2 * tb_ * tn_ * 4              # out tile, double-buffered
                + tb_ * Kpad * mm_bytes)         # Jacobi scratch slab

    while True:
        tn = None
        for cand in tn_cands:
            if working_set(tb, cand) <= vmem_budget:
                tn = cand
                break
        if tn is not None or tb <= 8:
            break
        tb = max(8, _round_up(tb // 2, 8))
    if tn is None:
        # TODO(synk): add a K-reduction ("arbitrary") grid axis with an f32
        # accumulator for huge (degree+1)*input_dim where even the minimal
        # tile overflows VMEM.
        tn = tn_cands[-1]
    return tb, tn, Opad


def kan_forward_prepared(x, coeffs, *, input_dim, output_dim, degree,
                         a=ALPHA, b=BETA, tb=2048):
    """x: any shape with trailing size input_dim.
    coeffs: output of prepare_kan_coeffs (shape (Kpad, Opad))."""
    K = (degree + 1) * input_dim
    Kpad, Opad_c = coeffs.shape
    assert Kpad == _round_up(K, 128), (Kpad, K)
    assert Opad_c == _round_up(output_dim, 128), (Opad_c, output_dim)

    x2d = jnp.reshape(x, (-1, input_dim)).astype(jnp.float32)
    batch = x2d.shape[0]

    mm_bytes = jnp.dtype(coeffs.dtype).itemsize
    vmem_cap = _vmem_capacity_bytes()
    tb_eff, tn, Opad = _choose_tiles(batch, input_dim, Kpad, output_dim, tb,
                                     mm_bytes, int(0.45 * vmem_cap))

    Bp = _round_up(batch, tb_eff)
    if Bp != batch:                       # avoid the pad round-trip if possible
        x2d = jnp.pad(x2d, ((0, Bp - batch), (0, 0)))

    # O-tiles OUTER, batch tiles INNER: the (Kpad, tn) coeff block stays
    # VMEM-resident across the fast batch axis (streamed from HBM once per j).
    grid = (Opad // tn, Bp // tb_eff)

    ws = (2 * tb_eff * input_dim * 4 + 2 * Kpad * tn * mm_bytes
          + 2 * tb_eff * tn * 4 + tb_eff * Kpad * mm_bytes)
    vmem_limit = int(min(int(0.9 * vmem_cap), max(32 * 2 ** 20, 2 * ws)))

    kernel = functools.partial(_kan_kernel, degree=degree, a=float(a),
                               b=float(b), input_dim=input_dim,
                               pad_k=Kpad - K)

    y = pl.pallas_call(
        kernel,
        out_shape=jax.ShapeDtypeStruct((Bp, Opad), jnp.float32),
        grid_spec=pltpu.PrefetchScalarGridSpec(
            num_scalar_prefetch=0,
            grid=grid,
            in_specs=[
                pl.BlockSpec((tb_eff, input_dim), lambda j, i: (i, 0)),
                pl.BlockSpec((Kpad, tn), lambda j, i: (0, j)),
            ],
            out_specs=pl.BlockSpec((tb_eff, tn), lambda j, i: (i, j)),
            scratch_shapes=[pltpu.VMEM((tb_eff, Kpad), coeffs.dtype)],
        ),
        compiler_params=pltpu.CompilerParams(
            dimension_semantics=("parallel", "parallel"),
            vmem_limit_bytes=vmem_limit,
        ),
    )(x2d, coeffs)

    if Bp != batch or Opad != output_dim:
        y = y[:batch, :output_dim]
    return y


def kan_forward(x, jacobi_coeffs, *, degree, a=ALPHA, b=BETA, tb=2048,
                matmul_dtype=jnp.bfloat16):
    """Convenience wrapper: repack coeffs every call (use prepare_kan_coeffs +
    kan_forward_prepared in hot loops)."""
    input_dim, output_dim, dp1 = jacobi_coeffs.shape
    assert dp1 == degree + 1
    coeffs = prepare_kan_coeffs(jacobi_coeffs, matmul_dtype=matmul_dtype)
    return kan_forward_prepared(x, coeffs, input_dim=input_dim,
                                output_dim=output_dim, degree=degree,
                                a=a, b=b, tb=tb)


def kan_reference(x, jacobi_coeffs, *, degree, a=ALPHA, b=BETA):
    """Pure-JAX reference matching the PyTorch forward exactly."""
    input_dim = jacobi_coeffs.shape[0]
    x = jnp.reshape(x, (-1, input_dim)).astype(jnp.float32)
    x = jnp.tanh(x)
    Bn = x.shape[0]
    jac = [jnp.ones((Bn, input_dim), jnp.float32)]
    if degree > 0:
        jac.append((a - b + (a + b + 2.0) * x) / 2.0)
    for i in range(2, degree + 1):
        A = (2 * i + a + b - 1) * (2 * i + a + b) / (2 * i * (i + a + b))
        B = (2 * i + a + b - 1) * (a ** 2 - b ** 2) / (
            2 * i * (i + a + b) * (2 * i + a + b - 2))
        C = (-2 * (i + a - 1) * (i + b - 1) * (2 * i + a + b)
             / (2 * i * (i + a + b) * (2 * i + a + b - 2)))
        jac.append((A * x + B) * jac[i - 1] + C * jac[i - 2])
    jacobi = jnp.stack(jac, axis=-1)  # (B, I, D+1)
    return jnp.einsum("bid,iod->bo", jacobi, jacobi_coeffs.astype(jnp.float32))


if __name__ == "__main__":
    input_dim = 16
    output_dim = 32
    degree = 4

    key = jax.random.PRNGKey(0)
    kx, kw = jax.random.split(key)

    # Example input: (2, 4, 16, 16) -> reshaped to (-1, 16) = (128, 16)
    x = jax.random.normal(kx, (2, 4, 16, input_dim), dtype=jnp.float32)

    # nn.init.normal_(mean=0, std=1/(input_dim*(degree+1))) on shape (I, O, D+1)
    std = 1.0 / (input_dim * (degree + 1))
    jacobi_coeffs = std * jax.random.normal(
        kw, (input_dim, output_dim, degree + 1), dtype=jnp.float32)

    # Hoisted coeff repack (once per parameter update); bf16 operands (default).
    coeffs_mat = prepare_kan_coeffs(jacobi_coeffs)
    y = jax.block_until_ready(
        kan_forward_prepared(x, coeffs_mat, input_dim=input_dim,
                             output_dim=output_dim, degree=degree))

    # f32-operand path for tight numerical validation of the kernel math.
    y_f32 = jax.block_until_ready(
        kan_forward(x, jacobi_coeffs, degree=degree,
                    matmul_dtype=jnp.float32))

    y_ref = jax.block_until_ready(
        kan_reference(x, jacobi_coeffs, degree=degree))

    assert y.shape == (2 * 4 * 16, output_dim), y.shape
    assert jnp.allclose(y_f32, y_ref, atol=1e-5, rtol=1e-5), float(
        jnp.max(jnp.abs(y_f32 - y_ref)))
    assert jnp.allclose(y, y_ref, atol=2e-2, rtol=2e-2), float(
        jnp.max(jnp.abs(y - y_ref)))

    print("KERNEL_OK")
</pallas_src>

<mosaic_0001>
module attributes {stable_mosaic.version = 11 : i64} {
  func.func @_kan_kernel(%arg0: i32, %arg1: i32, %arg2: memref<64x16xf32, #tpu.memory_space<vmem>>, %arg3: memref<128x128xbf16, #tpu.memory_space<vmem>>, %arg4: memref<64x128xf32, #tpu.memory_space<vmem>>, %arg5: memref<64x128xbf16, #tpu.memory_space<vmem>>) attributes {dimension_semantics = [#tpu.dimension_semantics<parallel>, #tpu.dimension_semantics<parallel>], iteration_bounds = array<i64: 1, 2>, scalar_prefetch = 0 : i64, scratch_operands = 1 : i64, tpu.core_type = #tpu.core_type<tc>, window_params = [{transform_indices = @transform_0, window_bounds = array<i64: 64, 16>}, {transform_indices = @transform_1, window_bounds = array<i64: 128, 128>}, {transform_indices = @transform_2, window_bounds = array<i64: 64, 128>}]} {
    %c0 = arith.constant 0 : index
    %c0_0 = arith.constant 0 : index
    %0 = vector.load %arg2[%c0, %c0_0] : memref<64x16xf32, #tpu.memory_space<vmem>>, vector<64x16xf32>
    %1 = math.tanh %0 : vector<64x16xf32>
    %cst = arith.constant 1.000000e+00 : f32
    %2 = vector.broadcast %cst : f32 to vector<64x16xf32>
    %3 = arith.truncf %2 : vector<64x16xf32> to vector<64x16xbf16>
    %c0_1 = arith.constant 0 : index
    %c0_2 = arith.constant 0 : index
    %4 = vector.load %arg5[%c0_1, %c0_2] : memref<64x128xbf16, #tpu.memory_space<vmem>>, vector<64x16xbf16>
    tpu.vector_store %arg5[%c0_1, %c0_2], %3 {strides = array<i32>} : memref<64x128xbf16, #tpu.memory_space<vmem>>, vector<64x16xbf16>,
    %cst_3 = arith.constant 4.000000e+00 : f32
    %5 = vector.broadcast %cst_3 : f32 to vector<64x16xf32>
    %6 = arith.mulf %5, %1 : vector<64x16xf32>
    %cst_4 = arith.constant 0.000000e+00 : f32
    %7 = vector.broadcast %cst_4 : f32 to vector<64x16xf32>
    %8 = arith.addf %7, %6 : vector<64x16xf32>
    %cst_5 = arith.constant 5.000000e-01 : f32
    %9 = vector.broadcast %cst_5 : f32 to vector<64x16xf32>
    %10 = arith.mulf %8, %9 : vector<64x16xf32>
    %11 = arith.truncf %10 : vector<64x16xf32> to vector<64x16xbf16>
    %c0_6 = arith.constant 0 : index
    %c16 = arith.constant 16 : index
    %12 = vector.load %arg5[%c0_6, %c16] : memref<64x128xbf16, #tpu.memory_space<vmem>>, vector<64x16xbf16>
    tpu.vector_store %arg5[%c0_6, %c16], %11 {strides = array<i32>} : memref<64x128xbf16, #tpu.memory_space<vmem>>, vector<64x16xbf16>,
    %cst_7 = arith.constant 1.875000e+00 : f32
    %13 = vector.broadcast %cst_7 : f32 to vector<64x16xf32>
    %14 = arith.mulf %13, %1 : vector<64x16xf32>
    %cst_8 = arith.constant 0.000000e+00 : f32
    %15 = vector.broadcast %cst_8 : f32 to vector<64x16xf32>
    %16 = arith.addf %14, %15 : vector<64x16xf32>
    %17 = arith.mulf %16, %10 : vector<64x16xf32>
    %cst_9 = arith.constant -7.500000e-01 : f32
    %18 = vector.broadcast %cst_9 : f32 to vector<64x16xf32>
    %19 = arith.mulf %18, %2 : vector<64x16xf32>
    %20 = arith.addf %17, %19 : vector<64x16xf32>
    %21 = arith.truncf %20 : vector<64x16xf32> to vector<64x16xbf16>
    %c0_10 = arith.constant 0 : index
    %c32 = arith.constant 32 : index
    %22 = vector.load %arg5[%c0_10, %c32] : memref<64x128xbf16, #tpu.memory_space<vmem>>, vector<64x16xbf16>
    tpu.vector_store %arg5[%c0_10, %c32], %21 {strides = array<i32>} : memref<64x128xbf16, #tpu.memory_space<vmem>>, vector<64x16xbf16>,
    %cst_11 = arith.constant 1.86666667 : f32
    %23 = vector.broadcast %cst_11 : f32 to vector<64x16xf32>
    %24 = arith.mulf %23, %1 : vector<64x16xf32>
    %cst_12 = arith.constant 0.000000e+00 : f32
    %25 = vector.broadcast %cst_12 : f32 to vector<64x16xf32>
    %26 = arith.addf %24, %25 : vector<64x16xf32>
    %27 = arith.mulf %26, %20 : vector<64x16xf32>
    %cst_13 = arith.constant -8.000000e-01 : f32
    %28 = vector.broadcast %cst_13 : f32 to vector<64x16xf32>
    %29 = arith.mulf %28, %10 : vector<64x16xf32>
    %30 = arith.addf %27, %29 : vector<64x16xf32>
    %31 = arith.truncf %30 : vector<64x16xf32> to vector<64x16xbf16>
    %c0_14 = arith.constant 0 : index
    %c48 = arith.constant 48 : index
    %32 = vector.load %arg5[%c0_14, %c48] : memref<64x128xbf16, #tpu.memory_space<vmem>>, vector<64x16xbf16>
    tpu.vector_store %arg5[%c0_14, %c48], %31 {strides = array<i32>} : memref<64x128xbf16, #tpu.memory_space<vmem>>, vector<64x16xbf16>,
    %cst_15 = arith.constant 1.875000e+00 : f32
    %33 = vector.broadcast %cst_15 : f32 to vector<64x16xf32>
    %34 = arith.mulf %33, %1 : vector<64x16xf32>
    %cst_16 = arith.constant 0.000000e+00 : f32
    %35 = vector.broadcast %cst_16 : f32 to vector<64x16xf32>
    %36 = arith.addf %34, %35 : vector<64x16xf32>
    %37 = arith.mulf %36, %30 : vector<64x16xf32>
    %cst_17 = arith.constant -0.833333313 : f32
    %38 = vector.broadcast %cst_17 : f32 to vector<64x16xf32>
    %39 = arith.mulf %38, %20 : vector<64x16xf32>
    %40 = arith.addf %37, %39 : vector<64x16xf32>
    %41 = arith.truncf %40 : vector<64x16xf32> to vector<64x16xbf16>
    %c0_18 = arith.constant 0 : index
    %c64 = arith.constant 64 : index
    %42 = vector.load %arg5[%c0_18, %c64] : memref<64x128xbf16, #tpu.memory_space<vmem>>, vector<64x16xbf16>
    tpu.vector_store %arg5[%c0_18, %c64], %41 {strides = array<i32>} : memref<64x128xbf16, #tpu.memory_space<vmem>>, vector<64x16xbf16>,
    %cst_19 = arith.constant 0.000000e+00 : bf16
    %43 = vector.broadcast %cst_19 : bf16 to vector<64x48xbf16>
    %c0_20 = arith.constant 0 : index
    %c80 = arith.constant 80 : index
    %44 = vector.load %arg5[%c0_20, %c80] : memref<64x128xbf16, #tpu.memory_space<vmem>>, vector<64x48xbf16>
    tpu.vector_store %arg5[%c0_20, %c80], %43 {strides = array<i32>} : memref<64x128xbf16, #tpu.memory_space<vmem>>, vector<64x48xbf16>,
    %c0_21 = arith.constant 0 : index
    %c0_22 = arith.constant 0 : index
    %45 = vector.load %arg5[%c0_21, %c0_22] : memref<64x128xbf16, #tpu.memory_space<vmem>>, vector<64x128xbf16>
    %c0_23 = arith.constant 0 : index
    %c0_24 = arith.constant 0 : index
    %46 = vector.load %arg3[%c0_23, %c0_24] : memref<128x128xbf16, #tpu.memory_space<vmem>>, vector<128x128xbf16>
    %cst_25 = arith.constant dense<0.000000e+00> : vector<64x128xf32>
    %47 = tpu.matmul %45, %46, %cst_25 {dimension_numbers = #tpu.dot_dimension_numbers<[1], [0], [0], [1], [0, 0, 1, 1], [], []>} : vector<64x128xbf16>, vector<128x128xbf16>, vector<64x128xf32> -> vector<64x128xf32>
    %c0_26 = arith.constant 0 : index
    %c0_27 = arith.constant 0 : index
    %48 = vector.load %arg4[%c0_26, %c0_27] : memref<64x128xf32, #tpu.memory_space<vmem>>, vector<64x128xf32>
    tpu.vector_store %arg4[%c0_26, %c0_27], %47 {strides = array<i32>} : memref<64x128xf32, #tpu.memory_space<vmem>>, vector<64x128xf32>,
    return
  }
  func.func @transform_0(%arg0: i32, %arg1: i32) -> (i32, i32) {
    %c0_i32 = arith.constant 0 : i32
    %c0_i32_0 = arith.constant 0 : i32
    return %arg1, %c0_i32 : i32, i32
  }
  func.func @transform_1(%arg0: i32, %arg1: i32) -> (i32, i32) {
    %c0_i32 = arith.constant 0 : i32
    %c0_i32_0 = arith.constant 0 : i32
    return %c0_i32, %arg0 : i32, i32
  }
  func.func @transform_2(%arg0: i32, %arg1: i32) -> (i32, i32) {
    %c0_i32 = arith.constant 0 : i32
    return %arg1, %arg0 : i32, i32
  }
}

</mosaic_0001>

<bundles_post_ra>
// kernel: tpu_custom_call.1
= control target key start
LH: loop header
LB: loop body
LE: loop exit
PB: predicated region body
PF: predicated region fallthrough
CT: control target
= control target key end

     0   :  { %7 = vsyncpa [#allocation4], 0  ;;  %s1272_s0 = inlined_call_operand.vmem [shape: f32[128,16], index: 0, kind: input, shape index: {}]   ;;  %s1273_s1 = inlined_call_operand.vmem [shape: bf16[128,128], index: 1, kind: input, shape index: {}]   ;;  %s1274_s2 = inlined_call_operand.hbm [shape: f32[128,128], index: 2, kind: output, shape index: {}]  }
   0x1   :  { %9 = vsyncpa [#allocation4 + $0x1], 0  ;;  %s1046_s9 = smov 0   ;;  %s1048_s10 = smov 0  }
   0x2   :  { %s1050_s11 = smov 0   ;;  %s1052_s12 = smov 0  }
   0x3   :  { %s1054_s13 = smov 0   ;;  %s1056_s14 = smov 0  }
   0x4 LB: > { %s765_s15 = sadd.s32 4294967295, %s1021_s14   ;;  %s766_s16 = sadd.s32 4294967294, %s1021_s14   ;;  %s1021_s14 = sphi %s1056_s14, %s15_s14   ;;  %s1017_s13 = sphi %s1054_s13, %s1281_s13   ;;  %s1013_s12 = sphi %s1052_s12, %s1280_s12   ;;  %s1009_s11 = sphi %s1050_s11, %s1279_s11   ;;  %s1005_s10 = sphi %s1048_s10, %s1278_s10   ;;  %s1001_s9 = sphi %s1046_s9, %s1277_s9  }
   0x5   : > { %s24_s17 = sadd.s32 1, %s1017_s13  ;;  %s88_s18 = sadd.s32 1, %s1009_s11 }
   0x6   : > { %p25_p0 = scmp.ge.s32.totalorder %s24_s17, 2  ;;  %p98_p1 = scmp.ne.s32.totalorder %s1009_s11, %s1005_s10 }
   0x7   : > { %p99_p2 = scmp.eq.s32.totalorder %s765_s15, 1  ;;  %p104_p3 = scmp.ne.s32.totalorder %s1005_s10, %s1001_s9 }
   0x8   : > { %s1283_s17 = smov (%p25_p0, %s24_s17), 0  ;;  %p105_p5 = scmp.eq.s32.totalorder %s766_s16, 1 }
   0x9   : > { %p1086_p4 = por %p99_p2, %p98_p1  ;;  %s83_s20 = ssub.s32 %s1017_s13, %s1283_s17 }
   0xa   : > { %p770_p6 = scmp.ge.s32.totalorder %s1021_s14, 1  ;;  %p86_p7 = scmp.eq.s32.totalorder %s83_s20, 0 }
   0xb   : > { %p1093_p8 = por %p105_p5, %p104_p3  ;;  %p139_p9 = scmp.lt.s32.totalorder %s1021_s14, 3 }
   0xc   : > { %s1099_s22 = scalar_select %p86_p7, %s1009_s11, %s88_s18  }
   0xd   : > { %p140_p10 = pnand %p770_p6, %p139_p9 }
   0xe   : > { %s772_s23 = sshll.u32 (!%p140_p10), %s1013_s12, 3  ;;  %s1023_s28 = smov (!%p140_p10), 16  }
   0xf   : > { %143 = sbr.rel (%p140_p10) target bundleno = 381 (0x17d), region = 28  ;;  %p166_p11 = scmp.lt.s32.totalorder (!%p140_p10), %s772_s23, 15 }
  0x10   : > { %s1024_s29 = smov (!%p140_p10), 32   ;;  %s1025_s30 = smov (!%p140_p10), 48  }
  0x11   : > { %s1026_s3 = smov (!%p140_p10), 64   ;;  %s839_s5 = sshll.u32 (!%p140_p10), %s1013_s12, 6 }
  0x12   : > { %s674_s8 = scalar_lea.hbm (!%p140_p10), %s1274_s2, %s839_s5  ;;  %s963_s25 = scalar_lea.hbm (!%p140_p10), %s1274_s2, 128 }
  0x13   : > { %s677_s16 = sshll.u32 (!%p140_p10), %s674_s8, 4  ;;  %s678_s16 = int_to_ptr.hbm [resolvable:$true] %s677_s16 }
  0x14   : > { %s1285_s23 = smov (!%p166_p11, %s772_s23), 15  ;;  %vm194_vm0 = vcmask 125952   ;;  %vm267_vm1 = vcmask 257152   ;;  %vm348_vm2 = vcmask 388352   ;;  %vm437_vm3 = vcmask 519552   ;;  %s957_s20 = sshra.s32 %s678_s16, 4  ;;  %s958_s20 = int_to_ptr.hbm [resolvable:$true] %s957_s20 }
  0x15   : > { %s773_s24 = sshll.u32 %s1285_s23, 3  ;;  %vm519_vm4 = vcmask 1044096   ;;  %vm510_vm5 = vcmask 650752   ;;  %s959_s23 = scalar_lea.hbm %s958_s20, 64 }
  0x16   : > { %s1105_s27 = scalar_lea.vmem %s1272_s0, %s773_s24  ;;  %p960_p12 = scmp.ne.s32.totalorder %s958_s20, %s959_s23 }
  0x17   : > { %v184_v0 = vld [vmem:[%s1105_s27 + $0x30] sm:$0xff]  ;;  %v182_v1 = vld [vmem:[%s1105_s27 + $0x20] sm:$0xff]  ;;  %v185_v2 = vld [vmem:[%s1105_s27 + $0x38] sm:$0xff]  ;;  %p964_p1 = scmp.lt.s32.totalorder %s958_s20, %s1274_s2  ;;  %p965_p2 = scmp.lt.s32.totalorder %s963_s25, %s959_s23 }
  0x18   : > { %927 = vtanh.f32 %v184_v0  ;;  %v183_v3 = vld [vmem:[%s1105_s27 + $0x28] sm:$0xff]  ;;  %v178_v48 = vld [vmem:[%s1105_s27] sm:$0xff]  ;;  %v181_v62 = vld [vmem:[%s1105_s27 + $0x18] sm:$0xff]  ;;  %p961_p13 = pnand %p960_p12, %p1086_p4 }
  0x19   : > { %929 = vtanh.f32 %v182_v1  ;;  %v179_v60 = vld [vmem:[%s1105_s27 + $0x8] sm:$0xff]  ;;  %p966_p3 = por %p965_p2, %p964_p1 }
  0x1a   : > { %931 = vtanh.f32 %v185_v2  ;;  %v180_v2 = vld [vmem:[%s1105_s27 + $0x10] sm:$0xff]  ;;  %p962_p0 = pneg %p961_p13 }
  0x1b   : > { %933 = vtanh.f32 %v183_v3 }
  0x1c   : > { %935 = vtanh.f32 %v178_v48  ;;  %p967_p5 = pnand %p966_p3, %p962_p0 }
  0x1d   : > { %937 = vtanh.f32 %v179_v60 }
  0x1e   : > { %v928_v4 = vpop.eup %927  ;;  %939 = vtanh.f32 %v181_v62 }
  0x1f   : > { %v930_v5 = vpop.eup %929  ;;  %v209_v6 = vmul.f32 4.0, %v928_v4  ;;  %v282_v22 = vmul.f32 1.875, %v928_v4  ;;  %v363_v33 = vmul.f32 1.8666667, %v928_v4  ;;  %941 = vtanh.f32 %v180_v2 }
  0x20   : > { %v932_v7 = vpop.eup %931  ;;  %v207_v8 = vmul.f32 4.0, %v930_v5  ;;  %v280_v9 = vmul.f32 1.875, %v930_v5  ;;  %v361_v31 = vmul.f32 1.8666667, %v930_v5 }
  0x21   : > { %v934_v10 = vpop.eup %933  ;;  %v225_v11 = vmul.f32 0.5, %v209_v6  ;;  %v210_v12 = vmul.f32 4.0, %v932_v7  ;;  %v1112_v20 = vmul.f32 1.875, %v932_v7  ;;  %v364_v46 = vmul.f32 1.8666667, %v932_v7 }
  0x22   : > { %v223_v13 = vmul.f32 0.5, %v207_v8  ;;  %v208_v14 = vmul.f32 4.0, %v934_v10  ;;  %v281_v18 = vmul.f32 1.875, %v934_v10  ;;  %v362_v35 = vmul.f32 1.8666667, %v934_v10  ;;  %v936_v63 = vpop.eup %935 }
  0x23   : > { %v233_v15 = vpack.c.bf16 %v225_v11, %v225_v11  ;;  %v226_v19 = vmul.f32 0.5, %v210_v12  ;;  %v298_v29 = vmul.f32 %v282_v22, %v225_v11  ;;  %v387_v41 = vmul.f32 -0.8, %v225_v11  ;;  %v938_v11 = vpop.eup %937 }
  0x24   : > { %v231_v16 = vpack.c.bf16 %v223_v13, %v223_v13  ;;  %v296_v17 = vmul.f32 %v280_v9, %v223_v13  ;;  %v224_v21 = vmul.f32 0.5, %v208_v14  ;;  %v385_v38 = vmul.f32 -0.8, %v223_v13  ;;  %v940_v13 = vpop.eup %939 }
  0x25   : > { %255 = vrot.lane.b32.xlu1 %v233_v15, %s1023_s28  ;;  %v234_v26 = vpack.c.bf16 %v226_v19, %v226_v19  ;;  %v299_v27 = vmul.f32 %v1112_v20, %v226_v19  ;;  %v306_v34 = vadd.f32 -0.75, %v298_v29  ;;  %v388_v52 = vmul.f32 -0.8, %v226_v19 }
  0x26   : > { %251 = vrot.lane.b32.xlu0 %v231_v16, %s1023_s28  ;;  %v304_v23 = vadd.f32 -0.75, %v296_v17  ;;  %v297_v25 = vmul.f32 %v281_v18, %v224_v21  ;;  %v232_v28 = vpack.c.bf16 %v224_v21, %v224_v21  ;;  %v386_v44 = vmul.f32 -0.8, %v224_v21  ;;  %v942_v16 = vpop.eup %941 }
  0x27   : > { %v307_v32 = vadd.f32 -0.75, %v299_v27  ;;  %v379_v40 = vmul.f32 %v363_v33, %v306_v34  ;;  %v314_v42 = vpack.c.bf16 %v306_v34, %v306_v34  ;;  %v460_v4 = vmul.f32 -0.8333333, %v306_v34 }
  0x28   : > { %v312_v24 = vpack.c.bf16 %v304_v23, %v304_v23  ;;  %v305_v30 = vadd.f32 -0.75, %v297_v25  ;;  %v377_v37 = vmul.f32 %v361_v31, %v304_v23  ;;  %v458_v58 = vmul.f32 -0.8333333, %v304_v23 }
  0x29   : > { %v315_v39 = vpack.c.bf16 %v307_v32, %v307_v32  ;;  %v395_v47 = vadd.f32 %v387_v41, %v379_v40  ;;  %v380_v51 = vmul.f32 %v364_v46, %v307_v32  ;;  %v203_v6 = vmul.f32 4.0, %v936_v63 }
  0x2a   : > { %332 = vrot.lane.b32.xlu2 %v312_v24, %s1024_s29  ;;  %v313_v36 = vpack.c.bf16 %v305_v30, %v305_v30  ;;  %v378_v43 = vmul.f32 %v362_v35, %v305_v30  ;;  %v393_v45 = vadd.f32 %v385_v38, %v377_v37  ;;  %v459_v55 = vmul.f32 -0.8333333, %v305_v30 }
  0x2b   : > { %v403_v53 = vpack.c.bf16 %v395_v47, %v395_v47  ;;  %v396_v59 = vadd.f32 %v388_v52, %v380_v51  ;;  %v452_v3 = vmul.f32 %v395_v47, %v282_v22  ;;  %v219_v12 = vmul.f32 0.5, %v203_v6 }
  0x2c   : > { %v394_v49 = vadd.f32 %v386_v44, %v378_v43  ;;  %v401_v50 = vpack.c.bf16 %v393_v45, %v393_v45  ;;  %v450_v57 = vmul.f32 %v393_v45, %v280_v9  ;;  %v461_v9 = vmul.f32 -0.8333333, %v307_v32 }
  0x2d   : > { %257 = vrot.lane.b32.xlu1 %v234_v26, %s1023_s28  ;;  %v404_v1 = vpack.c.bf16 %v396_v59, %v396_v59  ;;  %v453_v8 = vmul.f32 %v396_v59, %v1112_v20  ;;  %v468_v10 = vadd.f32 %v460_v4, %v452_v3  ;;  %v204_v17 = vmul.f32 4.0, %v938_v11 }
  0x2e   : > { %253 = vrot.lane.b32.xlu0 %v232_v28, %s1023_s28  ;;  %v451_v54 = vmul.f32 %v394_v49, %v281_v18  ;;  %v402_v56 = vpack.c.bf16 %v394_v49, %v394_v49  ;;  %v466_v0 = vadd.f32 %v458_v58, %v450_v57  ;;  %v227_v18 = vpack.c.bf16 %v219_v12, %v219_v12 }
  0x2f   : > { %v469_v14 = vadd.f32 %v461_v9, %v453_v8  ;;  %v476_v15 = vpack.c.bf16 %v468_v10, %v468_v10  ;;  %v206_v19 = vmul.f32 4.0, %v940_v13  ;;  %v205_v20 = vmul.f32 4.0, %v942_v16 }
  0x30   : > { %v467_v61 = vadd.f32 %v459_v55, %v451_v54  ;;  %v474_v7 = vpack.c.bf16 %v466_v0, %v466_v0  ;;  %v220_v22 = vmul.f32 0.5, %v204_v17  ;;  %v276_v23 = vmul.f32 1.875, %v936_v63 }
  0x31   : > { %v477_v21 = vpack.c.bf16 %v469_v14, %v469_v14  ;;  %v222_v24 = vmul.f32 0.5, %v206_v19  ;;  %v1135_v25 = vmul.f32 1.875, %v942_v16  ;;  %v221_v26 = vmul.f32 0.5, %v205_v20 }
  0x32   : > { %334 = vrot.lane.b32.xlu2 %v313_v36, %s1024_s29  ;;  %v475_v5 = vpack.c.bf16 %v467_v61, %v467_v61  ;;  %v277_v27 = vmul.f32 1.875, %v938_v11  ;;  %v228_v28 = vpack.c.bf16 %v220_v22, %v220_v22  ;;  %v292_v29 = vmul.f32 %v276_v23, %v219_v12 }
  0x33   : > { %v230_v30 = vpack.c.bf16 %v222_v24, %v222_v24  ;;  %v294_v31 = vmul.f32 %v1135_v25, %v221_v26  ;;  %v229_v32 = vpack.c.bf16 %v221_v26, %v221_v26  ;;  %v279_v35 = vmul.f32 1.875, %v940_v13 }
  0x34   : > { %v293_v33 = vmul.f32 %v277_v27, %v220_v22  ;;  %v300_v34 = vadd.f32 -0.75, %v292_v29  ;;  %v358_v37 = vmul.f32 1.8666667, %v938_v11  ;;  %v382_v45 = vmul.f32 -0.8, %v220_v22  ;;  %v837_v29 = vld [vmem:[%s1273_s1 + $0x30] sm:$0xff] }
  0x35   : > { %338 = vrot.lane.b32.xlu1 %v315_v39, %s1024_s29  ;;  %v302_v36 = vadd.f32 -0.75, %v294_v31  ;;  %v357_v39 = vmul.f32 1.8666667, %v936_v63  ;;  %v295_v41 = vmul.f32 %v279_v35, %v222_v24  ;;  %v381_v48 = vmul.f32 -0.8, %v219_v12 }
  0x36   : > { %336 = vrot.lane.b32.xlu0 %v314_v42, %s1024_s29  ;;  %v301_v38 = vadd.f32 -0.75, %v293_v33  ;;  %v308_v40 = vpack.c.bf16 %v300_v34, %v300_v34  ;;  %v1027_v42 = vmov 1065369472   ;;  %v454_v59 = vmul.f32 -0.8333333, %v300_v34 }
  0x37   : > { %201 = vst.msk [vmem:[#allocation2 + $0x18] sm:$0xf] %vm194_vm0, %v1027_v42  ;;  %v310_v43 = vpack.c.bf16 %v302_v36, %v302_v36  ;;  %v373_v47 = vmul.f32 %v357_v39, %v300_v34  ;;  %v303_v49 = vadd.f32 -0.75, %v295_v41  ;;  %v384_v62 = vmul.f32 -0.8, %v222_v24  ;;  %v835_v34 = vld [vmem:[%s1273_s1 + $0x20] sm:$0xff] }
  0x38   : > { %v374_v44 = vmul.f32 %v358_v37, %v301_v38  ;;  %195 = vst.msk [vmem:[#allocation2] sm:$0xf] %vm194_vm0, %v1027_v42  ;;  %v309_v46 = vpack.c.bf16 %v301_v38, %v301_v38  ;;  %v455_v4 = vmul.f32 -0.8333333, %v301_v38  ;;  %v456_v10 = vmul.f32 -0.8333333, %v302_v36 }
  0x39   : > { %196 = vst.msk [vmem:[#allocation2 + $0x4] sm:$0xf] %vm194_vm0, %v1027_v42  ;;  %v389_v52 = vadd.f32 %v381_v48, %v373_v47  ;;  %v311_v54 = vpack.c.bf16 %v303_v49, %v303_v49  ;;  %v832_v41 = vld [vmem:[%s1273_s1 + $0x8] sm:$0xff] }
  0x3a   : > { %421 = vrot.lane.b32.xlu2 %v401_v50, %s1025_s30  ;;  %197 = vst.msk [vmem:[#allocation2 + $0x8] sm:$0xf] %vm194_vm0, %v1027_v42  ;;  %v359_v50 = vmul.f32 1.8666667, %v942_v16  ;;  %v390_v51 = vadd.f32 %v382_v45, %v374_v44  ;;  %v831_v44 = vld [vmem:[%s1273_s1] sm:$0xff] }
  0x3b   : > { %198 = vst.msk [vmem:[#allocation2 + $0xc] sm:$0xf] %vm194_vm0, %v1027_v42  ;;  %v446_v58 = vmul.f32 %v389_v52, %v276_v23  ;;  %v397_v60 = vpack.c.bf16 %v389_v52, %v389_v52 }
  0x3c   : > { %199 = vst.msk [vmem:[#allocation2 + $0x10] sm:$0xf] %vm194_vm0, %v1027_v42  ;;  %v375_v55 = vmul.f32 %v359_v50, %v302_v36  ;;  %v398_v57 = vpack.c.bf16 %v390_v51, %v390_v51  ;;  %v447_v3 = vmul.f32 %v390_v51, %v277_v27  ;;  %v834_v36 = vld [vmem:[%s1273_s1 + $0x18] sm:$0xff] }
  0x3d   : > { %425 = vrot.lane.b32.xlu1 %v403_v53, %s1025_s30  ;;  %v360_v53 = vmul.f32 1.8666667, %v940_v13  ;;  %200 = vst.msk [vmem:[#allocation2 + $0x14] sm:$0xf] %vm194_vm0, %v1027_v42  ;;  %v462_v0 = vadd.f32 %v454_v59, %v446_v58 }
  0x3e   : > { %423 = vrot.lane.b32.xlu0 %v402_v56, %s1025_s30  ;;  %202 = vst.msk [vmem:[#allocation2 + $0x1c] sm:$0xf] %vm194_vm0, %v1027_v42  ;;  %v383_v56 = vmul.f32 -0.8, %v221_v26  ;;  %v463_v11 = vadd.f32 %v455_v4, %v447_v3 }
  0x3f   : > { %v376_v61 = vmul.f32 %v360_v53, %v303_v49 }
  0x40   : > { %v391_v63 = vadd.f32 %v383_v56, %v375_v55  ;;  %v471_v14 = vpack.c.bf16 %v463_v11, %v463_v11 }
  0x42   : > { %427 = vrot.lane.b32.xlu2 %v404_v1, %s1025_s30  ;;  %v392_v1 = vadd.f32 %v384_v62, %v376_v61  ;;  %v399_v2 = vpack.c.bf16 %v391_v63, %v391_v63  ;;  %v448_v9 = vmul.f32 %v391_v63, %v1135_v25  ;;  %v838_v25 = vld [vmem:[%s1273_s1 + $0x38] sm:$0xff] }
  0x43   : > { %841 = vmatpush.bf16.msra.mxu2 %v838_v25  ;;  %842 = vmatpush.bf16.msra.mxu3 %v838_v25 }
  0x44   : > { %v449_v6 = vmul.f32 %v392_v1, %v279_v35  ;;  %v400_v8 = vpack.c.bf16 %v392_v1, %v392_v1  ;;  %v464_v13 = vadd.f32 %v456_v10, %v448_v9  ;;  %624 = vmatpush.bf16.msra.mxu0 %v838_v25  ;;  %840 = vmatpush.bf16.msra.mxu1 %v838_v25  ;;  %v1028_v35 = vmov 0  }
  0x45   : > { %496 = vrot.lane.b32.xlu1 %v475_v5, %s1026_s3  ;;  %v470_v5 = vpack.c.bf16 %v462_v0, %v462_v0 }
  0x46   : > { %494 = vrot.lane.b32.xlu0 %v474_v7, %s1026_s3  ;;  %v457_v7 = vmul.f32 -0.8333333, %v303_v49  ;;  %v472_v16 = vpack.c.bf16 %v464_v13, %v464_v13 }
  0x47   : > { %844 = vmatpush.bf16.msra.mxu2 %v837_v29  ;;  %845 = vmatpush.bf16.msra.mxu3 %v837_v29 }
  0x48   : > { %v465_v12 = vadd.f32 %v457_v7, %v449_v6  ;;  %625 = vmatpush.bf16.msra.mxu0 %v837_v29  ;;  %843 = vmatpush.bf16.msra.mxu1 %v837_v29 }
  0x4a   : > { %498 = vrot.lane.b32.xlu2 %v476_v15, %s1026_s3  ;;  %v473_v15 = vpack.c.bf16 %v465_v12, %v465_v12 }
  0x4d   : > { %243 = vrot.lane.b32.xlu1 %v227_v18, %s1023_s28 }
  0x4e   : > { %500 = vrot.lane.b32.xlu0 %v477_v21, %s1026_s3 }
  0x52   : > { %245 = vrot.lane.b32.xlu2 %v228_v28, %s1023_s28 }
  0x55   : > { %249 = vrot.lane.b32.xlu1 %v230_v30, %s1023_s28  ;;  %v836_v30 = vld [vmem:[%s1273_s1 + $0x28] sm:$0xff] }
  0x56   : > { %247 = vrot.lane.b32.xlu0 %v229_v32, %s1023_s28  ;;  %847 = vmatpush.bf16.msra.mxu2 %v836_v30 }
  0x57   : > { %848 = vmatpush.bf16.msra.mxu3 %v836_v30  ;;  %626 = vmatpush.bf16.msra.mxu0 %v836_v30 }
  0x58   : > { %846 = vmatpush.bf16.msra.mxu1 %v836_v30 }
  0x5a   : > { %324 = vrot.lane.b32.xlu2 %v308_v40, %s1024_s29  ;;  %850 = vmatpush.bf16.msra.mxu2 %v835_v34  ;;  %v833_v40 = vld [vmem:[%s1273_s1 + $0x10] sm:$0xff] }
  0x5b   : > { %851 = vmatpush.bf16.msra.mxu3 %v835_v34  ;;  %627 = vmatpush.bf16.msra.mxu0 %v835_v34 }
  0x5c   : > { %849 = vmatpush.bf16.msra.mxu1 %v835_v34 }
  0x5d   : > { %328 = vrot.lane.b32.xlu1 %v310_v43, %s1024_s29 }
  0x5e   : > { %326 = vrot.lane.b32.xlu0 %v309_v46, %s1024_s29  ;;  %853 = vmatpush.bf16.msra.mxu2 %v834_v36 }
  0x5f   : > { %854 = vmatpush.bf16.msra.mxu3 %v834_v36  ;;  %628 = vmatpush.bf16.msra.mxu0 %v834_v36 }
  0x60   : > { %852 = vmatpush.bf16.msra.mxu1 %v834_v36 }
  0x62   : > { %330 = vrot.lane.b32.xlu2 %v311_v54, %s1024_s29  ;;  %856 = vmatpush.bf16.msra.mxu2 %v833_v40 }
  0x63   : > { %857 = vmatpush.bf16.msra.mxu3 %v833_v40  ;;  %629 = vmatpush.bf16.msra.mxu0 %v833_v40 }
  0x64   : > { %855 = vmatpush.bf16.msra.mxu1 %v833_v40 }
  0x65   : > { %415 = vrot.lane.b32.xlu1 %v398_v57, %s1025_s30 }
  0x66   : > { %413 = vrot.lane.b32.xlu0 %v397_v60, %s1025_s30  ;;  %859 = vmatpush.bf16.msra.mxu2 %v832_v41 }
  0x67   : > { %860 = vmatpush.bf16.msra.mxu3 %v832_v41  ;;  %630 = vmatpush.bf16.msra.mxu0 %v832_v41 }
  0x68   : > { %858 = vmatpush.bf16.msra.mxu1 %v832_v41 }
  0x6a   : > { %417 = vrot.lane.b32.xlu2 %v399_v2, %s1025_s30  ;;  %862 = vmatpush.bf16.msra.mxu2 %v831_v44 }
  0x6b   : > { %863 = vmatpush.bf16.msra.mxu3 %v831_v44  ;;  %631 = vmatpush.bf16.msra.mxu0 %v831_v44 }
  0x6c   : > { %861 = vmatpush.bf16.msra.mxu1 %v831_v44 }
  0x6d   : > { %486 = vrot.lane.b32.xlu1 %v470_v5, %s1026_s3 }
  0x6e   : > { %419 = vrot.lane.b32.xlu0 %v400_v8, %s1025_s30  ;;  %s162_s30 = sand.u32 1, %s1005_s10  }
  0x6f   : > { %s662_s18 = scalar_lea.sflag [#allocation4], %s162_s30 }
  0x72   : > { %488 = vrot.lane.b32.xlu2 %v471_v14, %s1026_s3 }
  0x75   : > { %492 = vrot.lane.b32.xlu1 %v473_v15, %s1026_s3 }
  0x76   : > { %490 = vrot.lane.b32.xlu0 %v472_v16, %s1026_s3  ;;  %s771_s3 = sshll.u32 %s162_s30, 6 }
  0x77   : > { %s164_s4 = scalar_lea.vmem [#allocation3], %s771_s3 }
  0x78   : > { %s675_s15 = sshll.u32 %s164_s4, 4  ;;  %s676_s15 = int_to_ptr.vmem [resolvable:$true] %s675_s15 }
  0x84   : > { %v333_v17 = vpop.permute.xlu2 %332 }
  0x8c   : > { %v335_v18 = vpop.permute.xlu2 %334 }
  0x94   : > { %v422_v19 = vpop.permute.xlu2 %421 }
  0x97   : > { %v256_v21 = vpop.permute.xlu1 %255 }
  0x98   : > { %274 = vst.msk [vmem:[#allocation2 + $0x18] sm:$0xf] %vm267_vm1, %v256_v21  ;;  %v252_v20 = vpop.permute.xlu0 %251 }
  0x99   : > { %272 = vst.msk [vmem:[#allocation2 + $0x10] sm:$0xf] %vm267_vm1, %v252_v20 }
  0x9a   : > { %353 = vst.msk [vmem:[#allocation2 + $0x10] sm:$0xf] %vm348_vm2, %v333_v17 }
  0x9b   : > { %442 = vst.msk [vmem:[#allocation2 + $0x10] sm:$0xf] %vm437_vm3, %v422_v19 }
  0x9c   : > { %v428_v22 = vpop.permute.xlu2 %427 }
  0x9f   : > { %v258_v23 = vpop.permute.xlu1 %257 }
  0xa0   : > { %275 = vst.msk [vmem:[#allocation2 + $0x1c] sm:$0xf] %vm267_vm1, %v258_v23  ;;  %v254_v24 = vpop.permute.xlu0 %253 }
  0xa1   : > { %273 = vst.msk [vmem:[#allocation2 + $0x14] sm:$0xf] %vm267_vm1, %v254_v24 }
  0xa2   : > { %354 = vst.msk [vmem:[#allocation2 + $0x14] sm:$0xf] %vm348_vm2, %v335_v18 }
  0xa4   : > { %v499_v26 = vpop.permute.xlu2 %498 }
  0xa7   : > { %v339_v27 = vpop.permute.xlu1 %338 }
  0xa8   : > { %356 = vst.msk [vmem:[#allocation2 + $0x1c] sm:$0xf] %vm348_vm2, %v339_v27  ;;  %v337_v28 = vpop.permute.xlu0 %336 }
  0xa9   : > { %355 = vst.msk [vmem:[#allocation2 + $0x18] sm:$0xf] %vm348_vm2, %v337_v28 }
  0xaa   : > { %445 = vst.msk [vmem:[#allocation2 + $0x1c] sm:$0xf] %vm437_vm3, %v428_v22 }
  0xac   : > { %v246_v31 = vpop.permute.xlu2 %245 }
  0xad   : > { %269 = vst.msk [vmem:[#allocation2 + $0x4] sm:$0xf] %vm267_vm1, %v246_v31 }
  0xaf   : > { %v426_v32 = vpop.permute.xlu1 %425 }
  0xb0   : > { %444 = vst.msk [vmem:[#allocation2 + $0x18] sm:$0xf] %vm437_vm3, %v426_v32  ;;  %v424_v33 = vpop.permute.xlu0 %423 }
  0xb1   : > { %443 = vst.msk [vmem:[#allocation2 + $0x14] sm:$0xf] %vm437_vm3, %v424_v33 }
  0xb2   : > { %517 = vst.msk [vmem:[#allocation2 + $0x18] sm:$0xf] %vm510_vm5, %v499_v26 }
  0xb3   : > { %526 = vst.msk [vmem:[#allocation2 + $0x18] sm:$0xf] %vm519_vm4, %v1028_v35 }
  0xb4   : > { %v325_v39 = vpop.permute.xlu2 %324 }
  0xb7   : > { %v497_v37 = vpop.permute.xlu1 %496 }
  0xb8   : > { %516 = vst.msk [vmem:[#allocation2 + $0x14] sm:$0xf] %vm510_vm5, %v497_v37  ;;  %v495_v38 = vpop.permute.xlu0 %494 }
  0xb9   : > { %525 = vst.msk [vmem:[#allocation2 + $0x14] sm:$0xf] %vm519_vm4, %v1028_v35 }
  0xba   : > { %515 = vst.msk [vmem:[#allocation2 + $0x10] sm:$0xf] %vm510_vm5, %v495_v38 }
  0xbb   : > { %524 = vst.msk [vmem:[#allocation2 + $0x10] sm:$0xf] %vm519_vm4, %v1028_v35 }
  0xbc   : > { %v331_v46 = vpop.permute.xlu2 %330 }
  0xbf   : > { %v244_v42 = vpop.permute.xlu1 %243 }
  0xc0   : > { %v501_v43 = vpop.permute.xlu0 %500  ;;  %268 = vst.msk [vmem:[#allocation2] sm:$0xf] %vm267_vm1, %v244_v42 }
  0xc1   : > { %518 = vst.msk [vmem:[#allocation2 + $0x1c] sm:$0xf] %vm510_vm5, %v501_v43 }
  0xc2   : > { %527 = vst.msk [vmem:[#allocation2 + $0x1c] sm:$0xf] %vm519_vm4, %v1028_v35  ;;  %v829_v45 = vld [vmem:[#allocation2 + $0x10] sm:$0xff] }
  0xc3   : > { %349 = vst.msk [vmem:[#allocation2] sm:$0xf] %vm348_vm2, %v325_v39  ;;  %642 = vmatmul.bf16.vlgmr.msra.gmra.mxu2 %v829_v45 }
  0xc4   : > { %v418_v50 = vpop.permute.xlu2 %417 }
  0xc7   : > { %v250_v47 = vpop.permute.xlu1 %249 }
  0xc8   : > { %v248_v48 = vpop.permute.xlu0 %247  ;;  %271 = vst.msk [vmem:[#allocation2 + $0xc] sm:$0xf] %vm267_vm1, %v250_v47 }
  0xc9   : > { %270 = vst.msk [vmem:[#allocation2 + $0x8] sm:$0xf] %vm267_vm1, %v248_v48  ;;  %v830_v49 = vld [vmem:[#allocation2 + $0x18] sm:$0xff] }
  0xca   : > { %352 = vst.msk [vmem:[#allocation2 + $0xc] sm:$0xf] %vm348_vm2, %v331_v46  ;;  %647 = vmatmul.bf16.vlgmr.msra.gmra.mxu3 %v830_v49 }
  0xcc   : > { %v489_v54 = vpop.permute.xlu2 %488 }
  0xcf   : > { %v329_v51 = vpop.permute.xlu1 %328 }
  0xd0   : > { %v327_v52 = vpop.permute.xlu0 %326  ;;  %351 = vst.msk [vmem:[#allocation2 + $0x8] sm:$0xf] %vm348_vm2, %v329_v51 }
  0xd1   : > { %350 = vst.msk [vmem:[#allocation2 + $0x4] sm:$0xf] %vm348_vm2, %v327_v52 }
  0xd2   : > { %440 = vst.msk [vmem:[#allocation2 + $0x8] sm:$0xf] %vm437_vm3, %v418_v50 }
  0xd7   : > { %v416_v53 = vpop.permute.xlu1 %415 }
  0xd8   : > { %v414_v55 = vpop.permute.xlu0 %413  ;;  %439 = vst.msk [vmem:[#allocation2 + $0x4] sm:$0xf] %vm437_vm3, %v416_v53 }
  0xd9   : > { %438 = vst.msk [vmem:[#allocation2] sm:$0xf] %vm437_vm3, %v414_v55 }
  0xda   : > { %512 = vst.msk [vmem:[#allocation2 + $0x4] sm:$0xf] %vm510_vm5, %v489_v54 }
  0xdb   : > { %521 = vst.msk [vmem:[#allocation2 + $0x4] sm:$0xf] %vm519_vm4, %v1028_v35 }
  0xdf   : > { %v487_v56 = vpop.permute.xlu1 %486 }
  0xe0   : > { %v420_v57 = vpop.permute.xlu0 %419  ;;  %511 = vst.msk [vmem:[#allocation2] sm:$0xf] %vm510_vm5, %v487_v56 }
  0xe1   : > { %441 = vst.msk [vmem:[#allocation2 + $0xc] sm:$0xf] %vm437_vm3, %v420_v57 }
  0xe2   : > { %520 = vst.msk [vmem:[#allocation2] sm:$0xf] %vm519_vm4, %v1028_v35 }
  0xe7   : > { %v493_v58 = vpop.permute.xlu1 %492 }
  0xe8   : > { %v491_v59 = vpop.permute.xlu0 %490  ;;  %514 = vst.msk [vmem:[#allocation2 + $0xc] sm:$0xf] %vm510_vm5, %v493_v58 }
  0xe9   : > { %513 = vst.msk [vmem:[#allocation2 + $0x8] sm:$0xf] %vm510_vm5, %v491_v59  ;;  %v827_v60 = vld [vmem:[#allocation2] sm:$0xff] }
  0xea   : > { %522 = vst.msk [vmem:[#allocation2 + $0x8] sm:$0xf] %vm519_vm4, %v1028_v35  ;;  %632 = vmatmul.bf16.vlgmr.msra.gmra.mxu0 %v827_v60 }
  0xeb   : > { %523 = vst.msk [vmem:[#allocation2 + $0xc] sm:$0xf] %vm519_vm4, %v1028_v35 }
  0xf2   : > { %v828_v61 = vld [vmem:[#allocation2 + $0x8] sm:$0xff] }
  0xf3   : > { %637 = vmatmul.bf16.vlgmr.msra.gmra.mxu1 %v828_v61 }
 0x146   : > { %v643_v62 = vpop.f32.mrf.mxu2 }
 0x147   : > { %657 = vst [vmem:[%s164_s4 + $0x20] sm:$0xff] %v643_v62 }
 0x14d   : > { %v648_v63 = vpop.f32.mrf.mxu3 }
 0x14e   : > { %659 = vst [vmem:[%s164_s4 + $0x30] sm:$0xff] %v648_v63  ;;  %v645_v0 = vpop.f32.mrf.mxu2 }
 0x14f   : > { %658 = vst [vmem:[%s164_s4 + $0x28] sm:$0xff] %v645_v0 }
 0x155   : > { %v650_v1 = vpop.f32.mrf.mxu3 }
 0x156   : > { %660 = vst [vmem:[%s164_s4 + $0x38] sm:$0xff] %v650_v1 }
 0x167   : > { %v633_v2 = vpop.f32.mrf.mxu0 }
 0x168   : > { %653 = vst [vmem:[%s164_s4] sm:$0xff] %v633_v2 }
 0x16f   : > { %v635_v3 = vpop.f32.mrf.mxu0 }
 0x170   : > { %654 = vst [vmem:[%s164_s4 + $0x8] sm:$0xff] %v635_v3  ;;  %v638_v4 = vpop.f32.mrf.mxu1 }
 0x171   : > { %655 = vst [vmem:[%s164_s4 + $0x10] sm:$0xff] %v638_v4 }
 0x178   : > { %v640_v5 = vpop.f32.mrf.mxu1 }
 0x179   : > { %656 = vst [vmem:[%s164_s4 + $0x18] sm:$0xff] %v640_v5 }
 0x17a   : > { %970 = shalt.err (!%p967_p5)
}
 0x17b   : > { %s1029_s28 = smov 128   ;;  %s1030_s29 = smov 8  }
 0x17c   : > { %864 = dma.vmem_to_hbm [thread:$0]  (%p1086_p4), %s676_s15, 1024, %s678_s16, %s662_s18, %s1029_s28, %s1029_s28, %s1030_s29  }
 0x17d PF: > { %p870_p6 = scmp.ge.s32.totalorder %s1021_s14, 2  ;;  %s692_s30 = sand.u32 1, %s1001_s9  }
 0x17e   : > { %s693_s3 = scalar_lea.sflag [#allocation4], %s692_s30 }
 0x17f   : > { %p867_p7 = pnand %p870_p6, %p1093_p8 }
 0x181   : > { %p868_p9 = pneg %p867_p7 }
 0x183   : > { %996 = dma.done.wait (%p868_p9), %s693_s3, 1024  }
 0x184   : > { %998 = vsyncadd (%p868_p9), %s693_s3, 4294966272  ;;  %s15_s14 = sadd.s32 1, %s1021_s14   ;;  %s1277_s9 = smov %s1005_s10 }
 0x185   : > { %p12_p10 = scmp.ge.s32.totalorder %s15_s14, 4   ;;  %s1278_s10 = smov %s1009_s11 }
 0x186   : > { %s1279_s11 = smov %s1099_s22  ;;  %s1280_s12 = smov %s1017_s13 }
 0x187   : > { %s1281_s13 = smov %s1283_s17  ;;  %14 = sbr.rel (!%p12_p10) target bundleno = 4 (0x4), region = 66 }
 0x18c   :  { %699 = vsyncpa [#allocation4], 1 }
 0x18d   :  { %701 = vsyncpa [#allocation4 + $0x1], 1 }

</bundles_post_ra>
